<compile_context>
chip_gen: v7x
topology: tpu7x:2x2x1
jax: 0.10.0
libtpu: 0.0.40
codegen_flags: <defaults>
</compile_context>

<pallas_src>
import functools
import math

import jax
import jax.numpy as jnp
from jax import lax
from jax.experimental import pallas as pl
from jax.experimental.pallas import tpu as pltpu


def _round_up(n: int, m: int) -> int:
    return ((n + m - 1) // m) * m


def _cdiv(a: int, b: int) -> int:
    return -(-a // b)


def _mlp_kernel(x_ref, w1_ref, b1_ref, w2_ref, b2_ref, w3_ref, b3_ref, o_ref, *, chunk):
    # x_ref: [2, TB] feature-major (batch on lanes).  Weights in PyTorch [out, in]
    # layout except w3 which the wrapper passes as a [32, 1] column.  o_ref: [1, TB].
    tb = x_ref.shape[1]
    n_chunks = tb // chunk

    w2 = w2_ref[...]                                            # [32, 32] (MXU LHS)

    # Chunk-invariant broadcasts hoisted out of the loop (JAX does not CSE
    # broadcast_in_dim; inside the loop they would be re-materialized every chunk).
    w1 = w1_ref[...]                                            # [32, 2]
    w1c0 = jnp.broadcast_to(w1[:, 0:1], (32, chunk))            # lane-broadcast
    w1c1 = jnp.broadcast_to(w1[:, 1:2], (32, chunk))
    b1b = jnp.broadcast_to(b1_ref[...], (32, chunk))
    b2b = jnp.broadcast_to(b2_ref[...], (32, chunk))
    w3b = jnp.broadcast_to(w3_ref[...], (32, chunk))            # w3 column [32, 1]
    b3b = jnp.broadcast_to(b3_ref[...], (1, chunk))

    def body(c, carry):
        col = pl.multiple_of(c * chunk, 128)                    # lane-aligned start
        x = x_ref[:, pl.ds(col, chunk)]                         # [2, chunk]
        x0 = jnp.broadcast_to(x[0:1, :], (32, chunk))           # sublane-broadcast
        x1 = jnp.broadcast_to(x[1:2, :], (32, chunk))

        # fc1 + ReLU (K=2 contraction): pure VPU broadcast FMAs, no MXU pass.
        h1 = jnp.maximum(w1c0 * x0 + w1c1 * x1 + b1b, 0.0)      # [32, chunk]

        # fc2 + ReLU on the MXU, f32 accumulation (exact module semantics).
        h2 = jnp.dot(w2, h1, preferred_element_type=jnp.float32) + b2b
        h2 = jnp.maximum(h2, 0.0)                               # [32, chunk]

        # fc3 (1 output feature) on VPU + XLU: scale rows by w3 and sublane-reduce,
        # instead of a second full-width MXU pass.
        y = jnp.sum(h2 * w3b, axis=0, keepdims=True) + b3b      # [1, chunk]
        o_ref[:, pl.ds(col, chunk)] = y
        return carry

    lax.fori_loop(0, n_chunks, body, 0, unroll=min(4, n_chunks))


def task_duration_nn_forward(x, params, *, block_batch=4096, chunk=256,
                             x_is_feature_major=False):
    """Forward pass matching TaskDurationNN.forward.

    x: [batch, 2] float32 (PyTorch layout), or [2, batch] if x_is_feature_major=True
       (avoids the wrapper-side transpose copy entirely).
    Returns [batch, 1] float32.
    """
    w1, b1, w2, b2, w3, b3 = params
    chunk = _round_up(max(int(chunk), 128), 128)

    if x_is_feature_major:
        batch = x.shape[1]
        x_fm = x.astype(jnp.float32)
    else:
        batch = x.shape[0]
        # Feature-major layout so the long batch axis maps to the 128-wide lane dim.
        x_fm = jnp.transpose(x.astype(jnp.float32))

    # Tile-count heuristic:
    #  - split large batches into ~block_batch tiles (pipelined, VMEM-friendly),
    #  - keep >=2 grid steps whenever possible so "parallel" can use both v7x TCs,
    #  - pad each tile only to 128-row granularity (minimal padding waste).
    n_tiles = max(1, _cdiv(batch, block_batch))
    if n_tiles == 1 and batch >= 2 * chunk:
        n_tiles = 2
    tb = _round_up(max(_cdiv(batch, n_tiles), 1), 128)
    # Largest lane-aligned chunk width <= requested chunk that divides the tile.
    c = 128 * math.gcd(tb // 128, chunk // 128)
    padded = tb * n_tiles

    if padded != batch:
        x_fm = jnp.pad(x_fm, ((0, 0), (0, padded - batch)))

    # w3 as a [32, 1] column (done on 128 bytes in XLA, keeps the kernel free of
    # tiny lane->sublane relayouts).
    w3_col = jnp.reshape(w3, (32, 1))

    resident = lambda i: (0, 0)  # weights/biases: same block every step -> stay in VMEM

    out_fm = pl.pallas_call(
        functools.partial(_mlp_kernel, chunk=c),
        out_shape=jax.ShapeDtypeStruct((1, padded), jnp.float32),
        grid=(n_tiles,),
        in_specs=[
            pl.BlockSpec((2, tb), lambda i: (0, i)),   # x tile, pipelined over batch
            pl.BlockSpec(w1.shape, resident),
            pl.BlockSpec(b1.shape, resident),
            pl.BlockSpec(w2.shape, resident),
            pl.BlockSpec(b2.shape, resident),
            pl.BlockSpec((32, 1), resident),           # w3 column
            pl.BlockSpec(b3.shape, resident),
        ],
        out_specs=pl.BlockSpec((1, tb), lambda i: (0, i)),  # lane-dense output slab
        compiler_params=pltpu.CompilerParams(
            dimension_semantics=("parallel",),  # v7x: shard batch tiles across both TCs
        ),
    )(x_fm, w1, b1, w2, b2, w3_col, b3)

    # 1-D slab -> PyTorch-facing [batch, 1] (no output transpose kernel).
    return out_fm.reshape(padded)[:batch][:, None]


def init_params(key):
    """Deterministic init mimicking PyTorch nn.Linear defaults (uniform +-1/sqrt(fan_in)).
    Weights stored [out_features, in_features] (PyTorch layout); biases [out_features, 1]."""
    def linear(k, fan_in, fan_out):
        kw, kb = jax.random.split(k)
        bound = 1.0 / float(fan_in) ** 0.5
        w = jax.random.uniform(kw, (fan_out, fan_in), jnp.float32, -bound, bound)
        b = jax.random.uniform(kb, (fan_out, 1), jnp.float32, -bound, bound)
        return w, b

    k1, k2, k3 = jax.random.split(key, 3)
    w1, b1 = linear(k1, 2, 32)
    w2, b2 = linear(k2, 32, 32)
    w3, b3 = linear(k3, 32, 1)
    return (w1, b1, w2, b2, w3, b3)


def _reference_forward(x, params):
    w1, b1, w2, b2, w3, b3 = params
    hp = jax.lax.Precision.HIGHEST
    h1 = jnp.maximum(jnp.dot(x, w1.T, precision=hp) + b1.T, 0.0)
    h2 = jnp.maximum(jnp.dot(h1, w2.T, precision=hp) + b2.T, 0.0)
    return jnp.dot(h2, w3.T, precision=hp) + b3.T


if __name__ == "__main__":
    key = jax.random.PRNGKey(0)
    kx, kp = jax.random.split(key)

    params = init_params(kp)

    # Small shape consistent with the module: batch of 8 tasks, 2 features each.
    batch = 8
    x = jax.random.normal(kx, (batch, 2), dtype=jnp.float32)

    out = jax.block_until_ready(task_duration_nn_forward(x, params))
    ref = _reference_forward(x, params)
    assert out.shape == (batch, 1)
    assert jnp.allclose(out, ref, atol=1e-4, rtol=1e-5)

    # Exercise multiple batch tiles, multiple chunks per tile, and padding.
    x_big = jax.random.normal(kx, (1000, 2), dtype=jnp.float32)
    out_big = jax.block_until_ready(
        task_duration_nn_forward(x_big, params, block_batch=512, chunk=128))
    ref_big = _reference_forward(x_big, params)
    assert out_big.shape == (1000, 1)
    assert jnp.allclose(out_big, ref_big, atol=1e-4, rtol=1e-5)

    # Feature-major fast path (no wrapper-side transpose of x).
    out_fm = jax.block_until_ready(
        task_duration_nn_forward(jnp.transpose(x_big), params,
                                 block_batch=512, x_is_feature_major=True))
    assert out_fm.shape == (1000, 1)
    assert jnp.allclose(out_fm, ref_big, atol=1e-4, rtol=1e-5)

    print("KERNEL_OK")
</pallas_src>

<mosaic_0001>
module attributes {stable_mosaic.version = 11 : i64} {
  func.func @_mlp_kernel(%arg0: i32, %arg1: memref<2x128xf32, #tpu.memory_space<vmem>>, %arg2: memref<32x2xf32, #tpu.memory_space<vmem>>, %arg3: memref<32x1xf32, #tpu.memory_space<vmem>>, %arg4: memref<32x32xf32, #tpu.memory_space<vmem>>, %arg5: memref<32x1xf32, #tpu.memory_space<vmem>>, %arg6: memref<32x1xf32, #tpu.memory_space<vmem>>, %arg7: memref<1x1xf32, #tpu.memory_space<vmem>>, %arg8: memref<1x128xf32, #tpu.memory_space<vmem>>) attributes {dimension_semantics = [#tpu.dimension_semantics<parallel>], iteration_bounds = array<i64: 1>, scalar_prefetch = 0 : i64, scratch_operands = 0 : i64, tpu.core_type = #tpu.core_type<tc>, window_params = [{transform_indices = @transform_0, window_bounds = array<i64: 2, 128>}, {pipeline_mode = #tpu.pipeline_mode<synchronous>, transform_indices = @transform_1, window_bounds = array<i64: 32, 2>}, {pipeline_mode = #tpu.pipeline_mode<synchronous>, transform_indices = @transform_2, window_bounds = array<i64: 32, 1>}, {pipeline_mode = #tpu.pipeline_mode<synchronous>, transform_indices = @transform_3, window_bounds = array<i64: 32, 32>}, {pipeline_mode = #tpu.pipeline_mode<synchronous>, transform_indices = @transform_4, window_bounds = array<i64: 32, 1>}, {pipeline_mode = #tpu.pipeline_mode<synchronous>, transform_indices = @transform_5, window_bounds = array<i64: 32, 1>}, {pipeline_mode = #tpu.pipeline_mode<synchronous>, transform_indices = @transform_6, window_bounds = array<i64: 1, 1>}, {transform_indices = @transform_7, window_bounds = array<i64: 1, 128>}]} {
    %c0 = arith.constant 0 : index
    %c0_0 = arith.constant 0 : index
    %0 = vector.load %arg4[%c0, %c0_0] : memref<32x32xf32, #tpu.memory_space<vmem>>, vector<32x32xf32>
    %c0_1 = arith.constant 0 : index
    %c0_2 = arith.constant 0 : index
    %1 = vector.load %arg2[%c0_1, %c0_2] : memref<32x2xf32, #tpu.memory_space<vmem>>, vector<32x2xf32>
    %2 = vector.extract_strided_slice %1 {offsets = [0, 0], sizes = [32, 1], strides = [1, 1]} : vector<32x2xf32> to vector<32x1xf32>
    %3 = vector.shape_cast %2 : vector<32x1xf32> to vector<32x1xf32>
    %4 = vector.broadcast %3 : vector<32x1xf32> to vector<32x128xf32>
    %5 = vector.extract_strided_slice %1 {offsets = [0, 1], sizes = [32, 1], strides = [1, 1]} : vector<32x2xf32> to vector<32x1xf32>
    %6 = vector.shape_cast %5 : vector<32x1xf32> to vector<32x1xf32>
    %7 = vector.broadcast %6 : vector<32x1xf32> to vector<32x128xf32>
    %c0_3 = arith.constant 0 : index
    %c0_4 = arith.constant 0 : index
    %8 = vector.load %arg3[%c0_3, %c0_4] : memref<32x1xf32, #tpu.memory_space<vmem>>, vector<32x1xf32>
    %9 = vector.shape_cast %8 : vector<32x1xf32> to vector<32x1xf32>
    %10 = vector.broadcast %9 : vector<32x1xf32> to vector<32x128xf32>
    %c0_5 = arith.constant 0 : index
    %c0_6 = arith.constant 0 : index
    %11 = vector.load %arg5[%c0_5, %c0_6] : memref<32x1xf32, #tpu.memory_space<vmem>>, vector<32x1xf32>
    %12 = vector.shape_cast %11 : vector<32x1xf32> to vector<32x1xf32>
    %13 = vector.broadcast %12 : vector<32x1xf32> to vector<32x128xf32>
    %c0_7 = arith.constant 0 : index
    %c0_8 = arith.constant 0 : index
    %14 = vector.load %arg6[%c0_7, %c0_8] : memref<32x1xf32, #tpu.memory_space<vmem>>, vector<32x1xf32>
    %15 = vector.shape_cast %14 : vector<32x1xf32> to vector<32x1xf32>
    %16 = vector.broadcast %15 : vector<32x1xf32> to vector<32x128xf32>
    %c0_9 = arith.constant 0 : index
    %c0_10 = arith.constant 0 : index
    %17 = vector.load %arg7[%c0_9, %c0_10] : memref<1x1xf32, #tpu.memory_space<vmem>>, vector<1x1xf32>
    %18 = vector.shape_cast %17 : vector<1x1xf32> to vector<1x1xf32>
    %19 = vector.broadcast %18 : vector<1x1xf32> to vector<1x128xf32>
    %c0_i32 = arith.constant 0 : i32
    %c128_i32 = arith.constant 128 : i32
    %20 = arith.muli %c0_i32, %c128_i32 : i32
    %21 = tpu.assume_multiple %20, 128 : i32
    %c0_11 = arith.constant 0 : index
    %22 = arith.index_cast %21 : i32 to index
    %23 = vector.load %arg1[%c0_11, %22] : memref<2x128xf32, #tpu.memory_space<vmem>>, vector<2x128xf32>
    %24 = vector.extract_strided_slice %23 {offsets = [0, 0], sizes = [1, 128], strides = [1, 1]} : vector<2x128xf32> to vector<1x128xf32>
    %25 = vector.shape_cast %24 : vector<1x128xf32> to vector<1x128xf32>
    %26 = vector.broadcast %25 : vector<1x128xf32> to vector<32x128xf32>
    %27 = vector.extract_strided_slice %23 {offsets = [1, 0], sizes = [1, 128], strides = [1, 1]} : vector<2x128xf32> to vector<1x128xf32>
    %28 = vector.shape_cast %27 : vector<1x128xf32> to vector<1x128xf32>
    %29 = vector.broadcast %28 : vector<1x128xf32> to vector<32x128xf32>
    %30 = arith.mulf %4, %26 : vector<32x128xf32>
    %31 = arith.mulf %7, %29 : vector<32x128xf32>
    %32 = arith.addf %30, %31 : vector<32x128xf32>
    %33 = arith.addf %32, %10 : vector<32x128xf32>
    %cst = arith.constant 0.000000e+00 : f32
    %34 = vector.broadcast %cst : f32 to vector<32x128xf32>
    %35 = arith.maximumf %33, %34 : vector<32x128xf32>
    %cst_12 = arith.constant dense<0.000000e+00> : vector<32x128xf32>
    %36 = tpu.matmul %0, %35, %cst_12 {dimension_numbers = #tpu.dot_dimension_numbers<[1], [0], [0], [1], [0, 0, 1, 1], [], []>} : vector<32x32xf32>, vector<32x128xf32>, vector<32x128xf32> -> vector<32x128xf32>
    %37 = arith.addf %36, %13 : vector<32x128xf32>
    %cst_13 = arith.constant 0.000000e+00 : f32
    %38 = vector.broadcast %cst_13 : f32 to vector<32x128xf32>
    %39 = arith.maximumf %37, %38 : vector<32x128xf32>
    %40 = arith.mulf %39, %16 : vector<32x128xf32>
    %cst_14 = arith.constant dense<0.000000e+00> : vector<128xf32>
    %41 = vector.multi_reduction <add>, %40, %cst_14 [0] : vector<32x128xf32> to vector<128xf32>
    %42 = vector.shape_cast %41 : vector<128xf32> to vector<1x128xf32>
    %43 = arith.addf %42, %19 : vector<1x128xf32>
    %c0_15 = arith.constant 0 : index
    %44 = arith.index_cast %21 : i32 to index
    %45 = vector.load %arg8[%c0_15, %44] : memref<1x128xf32, #tpu.memory_space<vmem>>, vector<1x128xf32>
    tpu.vector_store %arg8[%c0_15, %44], %43 {strides = array<i32>} : memref<1x128xf32, #tpu.memory_space<vmem>>, vector<1x128xf32>,
    %c1_i32 = arith.constant 1 : i32
    return
  }
  func.func @transform_0(%arg0: i32) -> (i32, i32) {
    %c0_i32 = arith.constant 0 : i32
    %c0_i32_0 = arith.constant 0 : i32
    return %c0_i32, %arg0 : i32, i32
  }
  func.func @transform_1(%arg0: i32) -> (i32, i32) {
    %c0_i32 = arith.constant 0 : i32
    %c0_i32_0 = arith.constant 0 : i32
    %c0_i32_1 = arith.constant 0 : i32
    return %c0_i32, %c0_i32_0 : i32, i32
  }
  func.func @transform_2(%arg0: i32) -> (i32, i32) {
    %c0_i32 = arith.constant 0 : i32
    %c0_i32_0 = arith.constant 0 : i32
    %c0_i32_1 = arith.constant 0 : i32
    return %c0_i32, %c0_i32_0 : i32, i32
  }
  func.func @transform_3(%arg0: i32) -> (i32, i32) {
    %c0_i32 = arith.constant 0 : i32
    %c0_i32_0 = arith.constant 0 : i32
    %c0_i32_1 = arith.constant 0 : i32
    return %c0_i32, %c0_i32_0 : i32, i32
  }
  func.func @transform_4(%arg0: i32) -> (i32, i32) {
    %c0_i32 = arith.constant 0 : i32
    %c0_i32_0 = arith.constant 0 : i32
    %c0_i32_1 = arith.constant 0 : i32
    return %c0_i32, %c0_i32_0 : i32, i32
  }
  func.func @transform_5(%arg0: i32) -> (i32, i32) {
    %c0_i32 = arith.constant 0 : i32
    %c0_i32_0 = arith.constant 0 : i32
    %c0_i32_1 = arith.constant 0 : i32
    return %c0_i32, %c0_i32_0 : i32, i32
  }
  func.func @transform_6(%arg0: i32) -> (i32, i32) {
    %c0_i32 = arith.constant 0 : i32
    %c0_i32_0 = arith.constant 0 : i32
    %c0_i32_1 = arith.constant 0 : i32
    return %c0_i32, %c0_i32_0 : i32, i32
  }
  func.func @transform_7(%arg0: i32) -> (i32, i32) {
    %c0_i32 = arith.constant 0 : i32
    %c0_i32_0 = arith.constant 0 : i32
    return %c0_i32, %arg0 : i32, i32
  }
}

</mosaic_0001>

<bundles_post_ra>
// kernel: tpu_custom_call.1
= control target key start
LH: loop header
LB: loop body
LE: loop exit
PB: predicated region body
PF: predicated region fallthrough
CT: control target
= control target key end

     0   :  { %s519_s0 = inlined_call_operand.vmem [shape: f32[2,128], index: 0, kind: input, shape index: {}]   ;;  %s520_s1 = inlined_call_operand.vmem [shape: f32[32,2], index: 1, kind: input, shape index: {}]   ;;  %s521_s2 = inlined_call_operand.vmem [shape: f32[32,1], index: 2, kind: input, shape index: {}]   ;;  %s522_s3 = inlined_call_operand.vmem [shape: f32[32,32], index: 3, kind: input, shape index: {}]   ;;  %s523_s4 = inlined_call_operand.vmem [shape: f32[32,1], index: 4, kind: input, shape index: {}]   ;;  %s524_s5 = inlined_call_operand.vmem [shape: f32[32,1], index: 5, kind: input, shape index: {}]   ;;  %s525_s6 = inlined_call_operand.<no memory space> [shape: f32[1,1], index: 6, kind: input, shape index: {}]   ;;  %s526_s7 = inlined_call_operand.hbm [shape: f32[1,128], index: 7, kind: output, shape index: {}]  }
   0x1   :  { %v12_v0 = vstv %s525_s6 }
   0x2   :  { %13 = vst [vmem:[#allocation2] sm:$0x1] %v12_v0 }
   0x3   :  { %v35_v1 = vld [vmem:[%s520_s1 + $0x10] sm:$0xff]  ;;  %v33_v2 = vld [vmem:[%s520_s1] sm:$0xff]  ;;  %v386_v3 = vmov 1   ;;  %v34_v4 = vld [vmem:[%s520_s1 + $0x8] sm:$0xff]  ;;  %v387_v5 = vmov 0  }
   0x4   :  { %358 = vset.pattern.permute.xlu0 %v386_v3  ;;  %356 = vset.pattern.permute.xlu1 %v386_v3 }
   0x5   :  { %66 = vperm.xlu0 %358, %v35_v1   ;;  %58 = vperm.xlu1 %356, %v33_v2  }
   0x9   :  { %359 = vset.pattern.permute.xlu0 %v387_v5  ;;  %62 = vperm.xlu1 %356, %v34_v4  }
   0xa   :  { %14 = vsyncpa [#allocation4], 0  ;;  %39 = vperm.xlu0 %359, %v33_v2   ;;  %v36_v6 = vld [vmem:[%s520_s1 + $0x18] sm:$0xff]  ;;  %v74_v7 = vld [vmem:[%s521_s2 + $0x8] sm:$0xff]  ;;  %vm184_vm0 = vcmask 261120   ;;  %v151_v22 = vlaneseq }
   0xb   :  { %v73_v8 = vld [vmem:[%s521_s2] sm:$0xff]  ;;  %v75_v10 = vld [vmem:[%s521_s2 + $0x10] sm:$0xff]  ;;  %v76_v12 = vld [vmem:[%s521_s2 + $0x18] sm:$0xff] }
   0xc   :  { %v97_v9 = vld [vmem:[%s523_s4] sm:$0xff]  ;;  %v99_v11 = vld [vmem:[%s523_s4 + $0x10] sm:$0xff]  ;;  %v98_v14 = vld [vmem:[%s523_s4 + $0x8] sm:$0xff]  ;;  %v488_v25 = vshrl.u32 %v151_v22, 7 }
   0xd   :  { %357 = vset.pattern.permute.xlu1 %v387_v5  ;;  %v121_v13 = vld [vmem:[%s524_s5] sm:$0xff]  ;;  %v123_v15 = vld [vmem:[%s524_s5 + $0x10] sm:$0xff]  ;;  %v100_v16 = vld [vmem:[%s523_s4 + $0x18] sm:$0xff] }
   0xe   :  { %44 = vperm.xlu0 %359, %v34_v4   ;;  %54 = vperm.xlu1 %357, %v36_v6   ;;  %v145_v17 = vld [vmem:[#allocation2] sm:$0x1]  ;;  %v31_v19 = vld [vmem:[%s522_s3 + $0x10] sm:$0xff]  ;;  %v122_v20 = vld [vmem:[%s524_s5 + $0x8] sm:$0xff]  ;;  %v153_v28 = vsub.s32 0, %v488_v25  ;;  %v162_v29 = vsub.s32 1, %v488_v25 }
   0xf   :  { %v29_v18 = vld [vmem:[%s522_s3] sm:$0xff]  ;;  %338 = vmatprep.mubr.msk.f32.mxu1 %vm184_vm0, %v31_v19  ;;  %v124_v21 = vld [vmem:[%s524_s5 + $0x18] sm:$0xff]  ;;  %v30_v63 = vld [vmem:[%s522_s3 + $0x8] sm:$0xff] }
  0x10   :  { %335 = vmatprep.mubr.msk.f32.mxu0 %vm184_vm0, %v29_v18  ;;  %v155_v30 = vld [vmem:[%s519_s0] sm:$0x3]  ;;  %v32_v0 = vld [vmem:[%s522_s3 + $0x18] sm:$0xff]  ;;  %s388_s3 = smov [#allocation3]  }
  0x11   :  { %v159_v33 = vrot.slane %v155_v30, %v153_v28  ;;  %v163_v34 = vrot.slane %v155_v30, %v162_v29  ;;  %s307_s15 = sshll.u32 %s388_s3, 4  ;;  %s308_s15 = int_to_ptr.vmem [resolvable:$true] %s307_s15 }
  0x12   :  { %49 = vperm.xlu0 %359, %v35_v1   ;;  %360 = vset.pattern.permute.xlu1 %v386_v3  ;;  %s362_s1 = scalar_lea.vmem %s308_s15, 16  ;;  %s366_s16 = scalar_lea.vmem %s308_s15, 32 }
  0x13   :  { %70 = vperm.xlu1 %360, %v36_v6   ;;  %p363_p0 = scmp.ne.s32.totalorder %s308_s15, %s362_s1  ;;  %p367_p1 = scmp.lt.s32.totalorder %s308_s15, %s308_s15 }
  0x14   :  { %p368_p2 = scmp.lt.s32.totalorder %s366_s16, %s362_s1 }
  0x16   :  { %84 = vperm.xlu0 %359, %v74_v7   ;;  %p369_p3 = por %p368_p2, %p367_p1 }
  0x17   :  { %361 = vset.pattern.permute.xlu1 %v387_v5 }
  0x18   :  { %79 = vperm.xlu1 %361, %v73_v8   ;;  %p370_p4 = pnand %p369_p3, %p363_p0 }
  0x1a   :  { %103 = vperm.xlu0 %359, %v97_v9  }
  0x1c   :  { %89 = vperm.xlu1 %361, %v75_v10  }
  0x1e   :  { %113 = vperm.xlu0 %359, %v99_v11  }
  0x20   :  { %94 = vperm.xlu1 %361, %v76_v12  }
  0x22   :  { %127 = vperm.xlu0 %359, %v121_v13  }
  0x24   :  { %108 = vperm.xlu1 %361, %v98_v14  }
  0x26   :  { %137 = vperm.xlu0 %359, %v123_v15  }
  0x28   :  { %118 = vperm.xlu1 %361, %v100_v16  }
  0x2a   :  { %148 = vperm.xlu0 %359, %v145_v17  }
  0x2c   :  { %132 = vperm.xlu1 %361, %v122_v20  }
  0x30   :  { %142 = vperm.xlu1 %361, %v124_v21  }
  0x84   :  { %v59_v23 = vpop.permute.xlu1 %58  ;;  %v67_v24 = vpop.permute.xlu0 %66 }
  0x85   :  { %v168_v40 = vmul.f32 %v163_v34, %v59_v23  ;;  %v170_v48 = vmul.f32 %v163_v34, %v67_v24 }
  0x88   :  { %v63_v26 = vpop.permute.xlu1 %62 }
  0x89   :  { %v40_v27 = vpop.permute.xlu0 %39  ;;  %v169_v37 = vmul.f32 %v163_v34, %v63_v26 }
  0x8a   :  { %v164_v38 = vmul.f32 %v159_v33, %v40_v27 }
  0x8c   :  { %v172_v44 = vadd.f32 %v168_v40, %v164_v38 }
  0x8d   :  { %v45_v31 = vpop.permute.xlu0 %44  ;;  %v55_v32 = vpop.permute.xlu1 %54 }
  0x8e   :  { %v165_v35 = vmul.f32 %v159_v33, %v45_v31  ;;  %v167_v53 = vmul.f32 %v159_v33, %v55_v32 }
  0x90   :  { %v173_v41 = vadd.f32 %v169_v37, %v165_v35 }
  0x91   :  { %v50_v36 = vpop.permute.xlu0 %49 }
  0x92   :  { %v71_v39 = vpop.permute.xlu1 %70  ;;  %v166_v46 = vmul.f32 %v159_v33, %v50_v36 }
  0x93   :  { %v171_v49 = vmul.f32 %v163_v34, %v71_v39 }
  0x94   :  { %v174_v55 = vadd.f32 %v170_v48, %v166_v46 }
  0x95   :  { %v85_v42 = vpop.permute.xlu0 %84  ;;  %v175_v57 = vadd.f32 %v171_v49, %v167_v53 }
  0x96   :  { %v177_v43 = vadd.f32 %v173_v41, %v85_v42 }
  0x97   :  { %v80_v45 = vpop.permute.xlu1 %79 }
  0x98   :  { %v176_v47 = vadd.f32 %v172_v44, %v80_v45  ;;  %v181_v50 = vmax.f32 %v177_v43, 0.0 }
  0x99   :  { %v104_v1 = vpop.permute.xlu0 %103 }
  0x9a   :  { %v180_v51 = vmax.f32 %v176_v47, 0.0 }
  0x9b   :  { %v90_v52 = vpop.permute.xlu1 %89 }
  0x9c   :  { %v341_v54 = vpack.c.bf16 %v181_v50, %v180_v51  ;;  %v178_v56 = vadd.f32 %v174_v55, %v90_v52 }
  0x9d   :  { %v114_v3 = vpop.permute.xlu0 %113 }
  0x9e   :  { %342 = vmatprep.subr.bf16.mxu0 %v341_v54  ;;  %349 = vmatprep.subr.bf16.mxu1 %v341_v54  ;;  %v182_v60 = vmax.f32 %v178_v56, 0.0 }
  0x9f   :  { %344 = vmatpush3.bf16.msra.mxu0 %v341_v54  ;;  %351 = vmatpush3.bf16.msra.mxu1 %v341_v54  ;;  %v95_v58 = vpop.permute.xlu1 %94 }
  0xa0   :  { %v179_v59 = vadd.f32 %v175_v57, %v95_v58 }
  0xa1   :  { %v128_v5 = vpop.permute.xlu0 %127 }
  0xa2   :  { %v183_v61 = vmax.f32 %v179_v59, 0.0 }
  0xa3   :  { %v109_v2 = vpop.permute.xlu1 %108 }
  0xa4   :  { %v345_v62 = vpack.c.bf16 %v183_v61, %v182_v60 }
  0xa5   :  { %v138_v21 = vpop.permute.xlu0 %137 }
  0xa6   :  { %346 = vmatprep.subr.bf16.mxu0 %v345_v62  ;;  %350 = vmatprep.subr.bf16.mxu1 %v345_v62 }
  0xa7   :  { %348 = vmatpush3.bf16.msra.mxu0 %v345_v62  ;;  %352 = vmatpush3.bf16.msra.mxu1 %v345_v62  ;;  %v119_v4 = vpop.permute.xlu1 %118 }
  0xa9   :  { %v149_v34 = vpop.permute.xlu0 %148 }
  0xaa   :  { %336 = vmatmul.mubr.msk.f32.vlgmr.msra.gmra.mrb[0].mxu0 %vm184_vm0, %v30_v63  ;;  %339 = vmatmul.mubr.msk.f32.vlgmr.msra.gmra.mrb[0].mxu1 %vm184_vm0, %v32_v0  ;;  %v154_v36 = vrot.slane %v149_v34, %v153_v28 }
  0xab   :  { %v133_v14 = vpop.permute.xlu1 %132 }
  0xaf   :  { %v143_v24 = vpop.permute.xlu1 %142 }
 0x17d   :  { %v337_v6 = vpop.f32.mrb[0].mxu0  ;;  %v340_v7 = vpop.f32.mrb[0].mxu1 }
 0x17e   :  { %v269_v8 = vadd.f32 %v337_v6, %v109_v2  ;;  %v263_v9 = vpop.f32.mrb[1].mxu0  ;;  %v273_v10 = vpop.f32.mrb[1].mxu1  ;;  %v279_v11 = vadd.f32 %v340_v7, %v119_v4 }
 0x17f   :  { %v264_v12 = vadd.f32 %v263_v9, %v104_v1  ;;  %v274_v13 = vadd.f32 %v273_v10, %v114_v3 }
 0x180   :  { %v283_v15 = vmax.f32 %v269_v8, 0.0  ;;  %v285_v19 = vmax.f32 %v279_v11, 0.0 }
 0x181   :  { %v282_v16 = vmax.f32 %v264_v12, 0.0  ;;  %v284_v17 = vmax.f32 %v274_v13, 0.0 }
 0x182   :  { %v287_v18 = vmul.f32 %v283_v15, %v133_v14  ;;  %v289_v26 = vmul.f32 %v285_v19, %v143_v24 }
 0x183   :  { %v286_v20 = vmul.f32 %v282_v16, %v128_v5  ;;  %v288_v23 = vmul.f32 %v284_v17, %v138_v21 }
 0x185   :  { %v290_v22 = vadd.f32 %v287_v18, %v286_v20 }
 0x187   :  { %v291_v27 = vadd.f32 %v290_v22, %v288_v23 }
 0x189   :  { %v292_v29 = vadd.f32 %v291_v27, %v289_v26 }
 0x18b   :  { %v293_v30 = vrot.slane %v292_v29, 4 }
 0x18d   :  { %v294_v31 = vadd.f32 %v293_v30, %v292_v29 }
 0x18f   :  { %v295_v32 = vrot.slane %v294_v31, 2 }
 0x191   :  { %v296_v33 = vadd.f32 %v295_v32, %v294_v31 }
 0x193   :  { %v297_v35 = vrot.slane %v296_v33, 1 }
 0x195   :  { %v298_v37 = vadd.f32 %v297_v35, %v296_v33 }
 0x197   :  { %v299_v38 = vadd.f32 %v298_v37, %v154_v36 }
 0x199   :  { %300 = vst [vmem:[#allocation3] sm:$0x1] %v299_v38 }
 0x19a   :  { %373 = shalt.err (!%p370_p4)
}
 0x19b   :  { %s374_s19 = scalar_lea.hbm %s526_s7, 16 }
 0x19c   :  { %p375_p5 = scmp.ne.s32.totalorder %s526_s7, %s374_s19  ;;  %p378_p6 = scmp.lt.u32.totalorder %s374_s19, %s526_s7 }
 0x19e   :  { %p380_p7 = pnand %p378_p6, %p375_p5 }
 0x1a0   :  { %383 = shalt.err (!%p380_p7)
}
 0x1a1   :  { %310 = dma.vmem_to_hbm [thread:$0]  %s308_s15, 16, %s526_s7, [#allocation4]  }
 0x1a2   :  { %384 = dma.done.wait [#allocation4], 16  }
 0x1a3   :  { %385 = vsyncadd [#allocation4], 4294967280 }
 0x1a4   :  { %314 = vsyncpa [#allocation4], 1 }

</bundles_post_ra>
